<compile_context>
chip_gen: v7x
topology: tpu7x:2x2x1
jax: 0.10.0
libtpu: 0.0.40
codegen_flags: <defaults>
</compile_context>

<pallas_src>
import jax
import jax.numpy as jnp
from jax.experimental import pallas as pl
from jax.experimental.pallas import tpu as pltpu

LANE = 128
SUBLANE = 8


def _round_up(n, m):
    return ((n + m - 1) // m) * m


def _cdiv(a, b):
    return (a + b - 1) // b


def _choose_tile_b(batch, max_tile_b=1024, min_tiles=2):
    """Pick a batch tile: minimal padding, <= max_tile_b rows, and (when the batch
    is big enough) at least `min_tiles` tiles so v7x's two TensorCores both run."""
    target_tiles = max(min_tiles, _cdiv(batch, max_tile_b))
    tile_b = _round_up(max(1, _cdiv(batch, target_tiles)), SUBLANE)
    return max(SUBLANE, tile_b)


def _make_qrnet_kernel(num_layers, compute_dtype, emit_q):
    """Kernel over refs: (x, w1, b1, ..., wk, bk, [mean_mat], out).
    The layer loop is unrolled at trace time."""

    def kernel(*refs):
        x_ref = refs[0]
        o_ref = refs[-1]
        h = x_ref[...].astype(compute_dtype)          # cast f32 -> bf16 in-kernel
        y = None
        for i in range(num_layers):
            w_ref = refs[1 + 2 * i]
            b_ref = refs[2 + 2 * i]
            # MXU matmul: bf16 operands, f32 accumulation; f32 bias epilogue.
            y = jnp.dot(h, w_ref[...], preferred_element_type=jnp.float32)
            y = y + b_ref[...]
            if i < num_layers - 1:
                h = jnp.maximum(y, 0.0).astype(compute_dtype)   # ReLU, back to bf16
        if emit_q:
            # Q head: mean over the N quantiles == y @ M, M[n*A + a, a] = 1/N.
            m_ref = refs[1 + 2 * num_layers]
            q = jnp.dot(y, m_ref[...], preferred_element_type=jnp.float32)
            o_ref[...] = q.astype(o_ref.dtype)        # tiny (tile_b, A) store
        else:
            o_ref[...] = y.astype(o_ref.dtype)        # exact-width store (no pad)

    return kernel


def prepare_qrnet_params(params, compute_dtype=jnp.bfloat16):
    """One-time packing of weights/biases for the kernel (call once, reuse forever).

    Hidden-layer widths are zero-padded to a multiple of 128 (lane-dense); the final
    layer keeps its exact width. INVARIANT: padded W columns, padded bias entries and
    the padded rows of the *next* W must be exactly zero so padded hidden activations
    stay 0 through ReLU and never leak into real outputs.
    Weights are (in_features, out_features), i.e. transposed vs torch.nn.Linear.
    """
    weights, biases = params["weights"], params["biases"]
    num_layers = len(weights)
    pw, pb = [], []
    prev = weights[0].shape[0]                        # input feature dim left as-is
    for i, (w, b) in enumerate(zip(weights, biases)):
        fin, fout = w.shape
        assert fin <= prev
        fout_p = _round_up(fout, LANE) if i < num_layers - 1 else fout
        wp = jnp.zeros((prev, fout_p), compute_dtype)
        wp = wp.at[:fin, :fout].set(w.astype(compute_dtype))
        bp = jnp.zeros((1, fout_p), jnp.float32)
        bp = bp.at[:, :fout].set(b.reshape(1, -1).astype(jnp.float32))
        pw.append(wp)
        pb.append(bp)
        prev = fout_p
    return {
        "weights": pw,
        "biases": pb,
        "in_features": weights[0].shape[0],
        "out_features": weights[-1].shape[1],
    }


def qrnet_forward(x, prepared, *, num_actions, N, max_tile_b=1024,
                  out_dtype=jnp.float32, return_q=False):
    """Pallas forward pass for QRNET.

    x:        (batch, state_shape) float32
    prepared: output of prepare_qrnet_params (padded bf16 W, f32 b)
    returns:  (batch, N, num_actions) quantiles, or (batch, num_actions) Q when
              return_q=True (fused mean over the quantile dim).
    """
    weights, biases = prepared["weights"], prepared["biases"]
    num_layers = len(weights)
    in_features = prepared["in_features"]
    out_features = prepared["out_features"]
    assert out_features == num_actions * N
    batch = x.shape[0]
    assert x.shape[1] == in_features
    compute_dtype = weights[0].dtype

    # --- Adaptive batch tiling (sublane-aligned, minimal padding, >=2 tiles). ---
    tile_b = _choose_tile_b(batch, max_tile_b)
    batch_p = _round_up(batch, tile_b)
    if batch_p != batch:
        x = jnp.pad(x, ((0, batch_p - batch), (0, 0)))
    grid = (batch_p // tile_b,)

    in_specs = [pl.BlockSpec((tile_b, in_features), lambda i: (i, 0))]
    flat_args = [x]
    for wp, bp in zip(weights, biases):
        # Weights/biases resident in VMEM across all batch tiles (block 0 always).
        in_specs.append(pl.BlockSpec(wp.shape, lambda i: (0, 0)))
        in_specs.append(pl.BlockSpec(bp.shape, lambda i: (0, 0)))
        flat_args += [wp, bp]

    if return_q:
        # Constant mean matrix: column n*num_actions + a contributes 1/N to action a.
        cols = jnp.arange(out_features) % num_actions
        mean_mat = (cols[:, None] == jnp.arange(num_actions)[None, :]).astype(
            jnp.float32) / float(N)
        in_specs.append(pl.BlockSpec(mean_mat.shape, lambda i: (0, 0)))
        flat_args.append(mean_mat)
        out_width = num_actions
    else:
        out_width = out_features

    out = pl.pallas_call(
        _make_qrnet_kernel(num_layers, compute_dtype, return_q),
        out_shape=jax.ShapeDtypeStruct((batch_p, out_width), out_dtype),
        grid=grid,
        in_specs=in_specs,
        # Block last dim == full array dim, so the exact (non-128-multiple) output
        # width is legal; 800 -> 6 full-lane vsts + one small masked vst per row.
        out_specs=pl.BlockSpec((tile_b, out_width), lambda i: (i, 0)),
        compiler_params=pltpu.CompilerParams(
            dimension_semantics=("parallel",),        # batch tiles -> v7x's 2 TCs
            vmem_limit_bytes=32 * 1024 * 1024),       # safe headroom for tile_b=1024
    )(*flat_args)

    if batch_p != batch:
        out = out[:batch]
    if return_q:
        return out
    return out.reshape(batch, N, num_actions)


def init_qrnet_params(key, state_shape, num_actions, N=200, layer_sizes=(50,),
                      dtype=jnp.float32):
    """Init matching the PyTorch module: kaiming_normal_ weights, zero biases.
    Weights stored transposed, (in_features, out_features)."""
    sizes = [state_shape] + list(layer_sizes) + [num_actions * N]
    weights, biases = [], []
    for i in range(len(sizes) - 1):
        fan_in, fan_out = sizes[i], sizes[i + 1]
        key, kw = jax.random.split(key)
        std = (2.0 / fan_in) ** 0.5          # kaiming_normal_ (fan_in, gain=sqrt(2))
        weights.append(std * jax.random.normal(kw, (fan_in, fan_out), dtype))
        biases.append(jnp.zeros((fan_out,), dtype))
    return {"weights": weights, "biases": biases}


if __name__ == "__main__":
    # Small shapes consistent with the module defaults: one hidden layer of 50,
    # N=200 quantiles, 4 actions.
    batch = 8
    state_shape = 32
    num_actions = 4
    N = 200
    layer_sizes = (50,)

    key = jax.random.PRNGKey(0)
    key, kx = jax.random.split(key)
    x = jax.random.normal(kx, (batch, state_shape), jnp.float32)

    params = init_qrnet_params(key, state_shape, num_actions, N, layer_sizes)
    prepared = prepare_qrnet_params(params)           # one-time packing

    quantiles = qrnet_forward(x, prepared, num_actions=num_actions, N=N)
    quantiles = jax.block_until_ready(quantiles)
    assert quantiles.shape == (batch, N, num_actions)

    # Fused Q head (QRNET.Q): mean over the quantile dim, computed in-kernel.
    q = qrnet_forward(x, prepared, num_actions=num_actions, N=N, return_q=True)
    q = jax.block_until_ready(q)
    assert q.shape == (batch, num_actions)

    # Reference with the same bf16-operand / f32-accumulate semantics.
    cd = jnp.bfloat16
    nlayers = len(params["weights"])
    h = x.astype(cd)
    for i, (w, b) in enumerate(zip(params["weights"], params["biases"])):
        y = jnp.dot(h, w.astype(cd), preferred_element_type=jnp.float32) + b
        h = jnp.maximum(y, 0.0).astype(cd) if i < nlayers - 1 else y
    ref_bf16 = h.reshape(batch, N, num_actions)
    assert jnp.allclose(quantiles, ref_bf16, atol=2e-2, rtol=2e-2), float(
        jnp.max(jnp.abs(quantiles - ref_bf16)))
    assert jnp.allclose(q, quantiles.mean(axis=1), atol=1e-2, rtol=1e-2), float(
        jnp.max(jnp.abs(q - quantiles.mean(axis=1))))

    # Loose sanity check against the pure-f32 PyTorch-equivalent math.
    # (bf16 operands deviate by ~1% relative; pass compute_dtype=jnp.float32 to
    # prepare_qrnet_params for an f32-operand path if the QR loss needs it.)
    hf = x
    for i, (w, b) in enumerate(zip(params["weights"], params["biases"])):
        hf = hf @ w + b
        if i < nlayers - 1:
            hf = jnp.maximum(hf, 0.0)
    ref_f32 = hf.reshape(batch, N, num_actions)
    assert jnp.allclose(quantiles, ref_f32, atol=0.25, rtol=0.1)

    print("KERNEL_OK")
</pallas_src>

<mosaic_0001>
module attributes {stable_mosaic.version = 11 : i64} {
  func.func @kernel(%arg0: i32, %arg1: memref<8x32xf32, #tpu.memory_space<vmem>>, %arg2: memref<32x128xbf16, #tpu.memory_space<vmem>>, %arg3: memref<1x128xf32, #tpu.memory_space<vmem>>, %arg4: memref<128x800xbf16, #tpu.memory_space<vmem>>, %arg5: memref<1x800xf32, #tpu.memory_space<vmem>>, %arg6: memref<8x800xf32, #tpu.memory_space<vmem>>) attributes {dimension_semantics = [#tpu.dimension_semantics<parallel>], iteration_bounds = array<i64: 1>, scalar_prefetch = 0 : i64, scratch_operands = 0 : i64, tpu.core_type = #tpu.core_type<tc>, window_params = [{transform_indices = @transform_0, window_bounds = array<i64: 8, 32>}, {pipeline_mode = #tpu.pipeline_mode<synchronous>, transform_indices = @transform_1, window_bounds = array<i64: 32, 128>}, {pipeline_mode = #tpu.pipeline_mode<synchronous>, transform_indices = @transform_2, window_bounds = array<i64: 1, 128>}, {pipeline_mode = #tpu.pipeline_mode<synchronous>, transform_indices = @transform_3, window_bounds = array<i64: 128, 800>}, {pipeline_mode = #tpu.pipeline_mode<synchronous>, transform_indices = @transform_4, window_bounds = array<i64: 1, 800>}, {transform_indices = @transform_5, window_bounds = array<i64: 8, 800>}]} {
    %c0 = arith.constant 0 : index
    %c0_0 = arith.constant 0 : index
    %0 = vector.load %arg1[%c0, %c0_0] : memref<8x32xf32, #tpu.memory_space<vmem>>, vector<8x32xf32>
    %1 = arith.truncf %0 : vector<8x32xf32> to vector<8x32xbf16>
    %c0_1 = arith.constant 0 : index
    %c0_2 = arith.constant 0 : index
    %2 = vector.load %arg2[%c0_1, %c0_2] : memref<32x128xbf16, #tpu.memory_space<vmem>>, vector<32x128xbf16>
    %cst = arith.constant dense<0.000000e+00> : vector<8x128xf32>
    %3 = tpu.matmul %1, %2, %cst {dimension_numbers = #tpu.dot_dimension_numbers<[1], [0], [0], [1], [0, 0, 1, 1], [], []>} : vector<8x32xbf16>, vector<32x128xbf16>, vector<8x128xf32> -> vector<8x128xf32>
    %c0_3 = arith.constant 0 : index
    %c0_4 = arith.constant 0 : index
    %4 = vector.load %arg3[%c0_3, %c0_4] : memref<1x128xf32, #tpu.memory_space<vmem>>, vector<1x128xf32>
    %5 = vector.broadcast %4 : vector<1x128xf32> to vector<8x128xf32>
    %6 = arith.addf %3, %5 : vector<8x128xf32>
    %cst_5 = arith.constant 0.000000e+00 : f32
    %7 = vector.broadcast %cst_5 : f32 to vector<8x128xf32>
    %8 = arith.maximumf %6, %7 : vector<8x128xf32>
    %9 = arith.truncf %8 : vector<8x128xf32> to vector<8x128xbf16>
    %c0_6 = arith.constant 0 : index
    %c0_7 = arith.constant 0 : index
    %10 = vector.load %arg4[%c0_6, %c0_7] : memref<128x800xbf16, #tpu.memory_space<vmem>>, vector<128x800xbf16>
    %cst_8 = arith.constant dense<0.000000e+00> : vector<8x800xf32>
    %11 = tpu.matmul %9, %10, %cst_8 {dimension_numbers = #tpu.dot_dimension_numbers<[1], [0], [0], [1], [0, 0, 1, 1], [], []>} : vector<8x128xbf16>, vector<128x800xbf16>, vector<8x800xf32> -> vector<8x800xf32>
    %c0_9 = arith.constant 0 : index
    %c0_10 = arith.constant 0 : index
    %12 = vector.load %arg5[%c0_9, %c0_10] : memref<1x800xf32, #tpu.memory_space<vmem>>, vector<1x800xf32>
    %13 = vector.broadcast %12 : vector<1x800xf32> to vector<8x800xf32>
    %14 = arith.addf %11, %13 : vector<8x800xf32>
    %c0_11 = arith.constant 0 : index
    %c0_12 = arith.constant 0 : index
    %15 = vector.load %arg6[%c0_11, %c0_12] : memref<8x800xf32, #tpu.memory_space<vmem>>, vector<8x800xf32>
    tpu.vector_store %arg6[%c0_11, %c0_12], %14 {strides = array<i32>} : memref<8x800xf32, #tpu.memory_space<vmem>>, vector<8x800xf32>,
    return
  }
  func.func @transform_0(%arg0: i32) -> (i32, i32) {
    %c0_i32 = arith.constant 0 : i32
    %c0_i32_0 = arith.constant 0 : i32
    return %arg0, %c0_i32 : i32, i32
  }
  func.func @transform_1(%arg0: i32) -> (i32, i32) {
    %c0_i32 = arith.constant 0 : i32
    %c0_i32_0 = arith.constant 0 : i32
    %c0_i32_1 = arith.constant 0 : i32
    return %c0_i32, %c0_i32_0 : i32, i32
  }
  func.func @transform_2(%arg0: i32) -> (i32, i32) {
    %c0_i32 = arith.constant 0 : i32
    %c0_i32_0 = arith.constant 0 : i32
    %c0_i32_1 = arith.constant 0 : i32
    return %c0_i32, %c0_i32_0 : i32, i32
  }
  func.func @transform_3(%arg0: i32) -> (i32, i32) {
    %c0_i32 = arith.constant 0 : i32
    %c0_i32_0 = arith.constant 0 : i32
    %c0_i32_1 = arith.constant 0 : i32
    return %c0_i32, %c0_i32_0 : i32, i32
  }
  func.func @transform_4(%arg0: i32) -> (i32, i32) {
    %c0_i32 = arith.constant 0 : i32
    %c0_i32_0 = arith.constant 0 : i32
    %c0_i32_1 = arith.constant 0 : i32
    return %c0_i32, %c0_i32_0 : i32, i32
  }
  func.func @transform_5(%arg0: i32) -> (i32, i32) {
    %c0_i32 = arith.constant 0 : i32
    %c0_i32_0 = arith.constant 0 : i32
    return %arg0, %c0_i32 : i32, i32
  }
}

</mosaic_0001>

<bundles_post_ra>
// kernel: tpu_custom_call.1
= control target key start
LH: loop header
LB: loop body
LE: loop exit
PB: predicated region body
PF: predicated region fallthrough
CT: control target
= control target key end

     0   :  { %v876_v1 = vmov 0.0   ;;  %vm877_vm0 = vmmov 0   ;;  %vm47_vm1 = vcmask 261120   ;;  %s1121_s0 = inlined_call_operand.vmem [shape: f32[8,32], index: 0, kind: input, shape index: {}]   ;;  %s1122_s1 = inlined_call_operand.vmem [shape: bf16[32,128], index: 1, kind: input, shape index: {}]   ;;  %s1123_s2 = inlined_call_operand.vmem [shape: f32[1,128], index: 2, kind: input, shape index: {}]   ;;  %s1124_s3 = inlined_call_operand.vmem [shape: bf16[128,800], index: 3, kind: input, shape index: {}]   ;;  %s1125_s4 = inlined_call_operand.vmem [shape: f32[1,800], index: 4, kind: input, shape index: {}]   ;;  %s1126_s5 = inlined_call_operand.hbm [shape: f32[8,800], index: 5, kind: output, shape index: {}]  }
   0x1   :  { %v770_v0 = vld [vmem:[%s1122_s1] sm:$0xff]   ;;  %738 = vmatprep.subr.bf16.mxu0 %v876_v1  ;;  %v771_v2 = vld [vmem:[%s1122_s1 + $0x8] sm:$0xff]   ;;  %742 = vmatprep.mubr.msk.bf16.mxu0 %vm877_vm0, %v876_v1  ;;  %v778_v8 = vld [vmem:[%s1124_s3 + $0x3c] ss:$28 sps:$4 sm:$0xff]  }
   0x2   :  { %739 = vmatpush3.bf16.msra.mxu0 %v770_v0  ;;  %v22_v3 = vld [vmem:[%s1121_s0] sm:$0xff]  ;;  %v776_v5 = vld [vmem:[%s1124_s3 + $0xc] ss:$28 sps:$4 sm:$0xff]   ;;  %v783_v11 = vld [vmem:[%s1124_s3 + $0x38] ss:$28 sps:$4 sm:$0xff]  }
   0x3   :  { %740 = vmatprep.subr.bf16.mxu0 %v876_v1  ;;  %v772_v4 = vld [vmem:[%s1124_s3 + $0x4] ss:$28 sps:$4 sm:$0xff]   ;;  %v23_v7 = vpack.c.bf16 %v22_v3, %v22_v3  ;;  %v784_v12 = vld [vmem:[%s1124_s3 + $0x74] ss:$28 sps:$4 sm:$0xff]   ;;  %v788_v14 = vld [vmem:[%s1124_s3 + $0x7c] ss:$28 sps:$4 sm:$0xff]  }
   0x4   :  { %v777_v6 = vld [vmem:[%s1124_s3] ss:$28 sps:$4 sm:$0xff]   ;;  %482 = vmatprep.subr.bf16.mxu1 %v772_v4  ;;  %v774_v9 = vld [vmem:[%s1124_s3 + $0x8] ss:$28 sps:$4 sm:$0xff]   ;;  %v789_v15 = vld [vmem:[%s1124_s3 + $0x70] ss:$28 sps:$4 sm:$0xff]  }
   0x5   :  { %483 = vmatpush1.bf16.msra.mxu1 %v777_v6  ;;  %v782_v10 = vld [vmem:[%s1124_s3 + $0x44] ss:$28 sps:$4 sm:$0xff]   ;;  %v790_v16 = vld [vmem:[%s1124_s3 + $0xac] ss:$28 sps:$4 sm:$0xff]   ;;  %v786_v17 = vld [vmem:[%s1124_s3 + $0x78] ss:$28 sps:$4 sm:$0xff]  }
   0x6   :  { %741 = vmatpush3.bf16.msra.mxu0 %v771_v2  ;;  %484 = vmatprep.subr.bf16.mxu1 %v778_v8  ;;  %v780_v13 = vld [vmem:[%s1124_s3 + $0x40] ss:$28 sps:$4 sm:$0xff]   ;;  %v795_v18 = vld [vmem:[%s1124_s3 + $0xa8] ss:$28 sps:$4 sm:$0xff]   ;;  %v794_v19 = vld [vmem:[%s1124_s3 + $0xb4] ss:$28 sps:$4 sm:$0xff]  }
   0x7   :  { %523 = vmatprep.subr.bf16.mxu0 %v776_v5  ;;  %v796_v20 = vld [vmem:[%s1124_s3 + $0xe4] ss:$28 sps:$4 sm:$0xff]   ;;  %v792_v21 = vld [vmem:[%s1124_s3 + $0xb0] ss:$28 sps:$4 sm:$0xff]   ;;  %v802_v24 = vld [vmem:[%s1124_s3 + $0x11c] ss:$28 sps:$4 sm:$0xff]  }
   0x8   :  { %v800_v22 = vld [vmem:[%s1124_s3 + $0xec] ss:$28 sps:$4 sm:$0xff]   ;;  %v801_v23 = vld [vmem:[%s1124_s3 + $0xe0] ss:$28 sps:$4 sm:$0xff]   ;;  %v807_v26 = vld [vmem:[%s1124_s3 + $0x118] ss:$28 sps:$4 sm:$0xff]  }
   0x9   :  { %743 = vmatmul.mubr.msk.bf16.vlgmr.msra.gmra.mrb[0].mxu0 %vm47_vm1, %v23_v7  ;;  %485 = vmatpush1.bf16.msra.mxu1 %v783_v11  ;;  %v798_v25 = vld [vmem:[%s1124_s3 + $0xe8] ss:$28 sps:$4 sm:$0xff]   ;;  %v808_v28 = vld [vmem:[%s1124_s3 + $0x154] ss:$28 sps:$4 sm:$0xff]   ;;  %v804_v29 = vld [vmem:[%s1124_s3 + $0x120] ss:$28 sps:$4 sm:$0xff]  }
   0xa   :  { %524 = vmatpush1.bf16.msra.mxu0 %v774_v9  ;;  %486 = vmatprep.subr.bf16.mxu1 %v784_v12  ;;  %v806_v27 = vld [vmem:[%s1124_s3 + $0x124] ss:$28 sps:$4 sm:$0xff]   ;;  %v813_v30 = vld [vmem:[%s1124_s3 + $0x150] ss:$28 sps:$4 sm:$0xff]   ;;  %v812_v31 = vld [vmem:[%s1124_s3 + $0x15c] ss:$28 sps:$4 sm:$0xff]  }
   0xb   :  { %525 = vmatprep.subr.bf16.mxu0 %v782_v10  ;;  %v810_v32 = vld [vmem:[%s1124_s3 + $0x158] ss:$28 sps:$4 sm:$0xff]  }
   0xd   :  { %487 = vmatpush1.bf16.msra.mxu1 %v789_v15 }
   0xe   :  { %526 = vmatpush1.bf16.msra.mxu0 %v780_v13  ;;  %488 = vmatprep.subr.bf16.mxu1 %v790_v16 }
   0xf   :  { %527 = vmatprep.subr.bf16.mxu0 %v788_v14 }
  0x11   :  { %489 = vmatpush1.bf16.msra.mxu1 %v795_v18 }
  0x12   :  { %528 = vmatpush1.bf16.msra.mxu0 %v786_v17  ;;  %490 = vmatprep.subr.bf16.mxu1 %v796_v20 }
  0x13   :  { %529 = vmatprep.subr.bf16.mxu0 %v794_v19 }
  0x15   :  { %491 = vmatpush1.bf16.msra.mxu1 %v801_v23 }
  0x16   :  { %530 = vmatpush1.bf16.msra.mxu0 %v792_v21  ;;  %492 = vmatprep.subr.bf16.mxu1 %v802_v24 }
  0x17   :  { %531 = vmatprep.subr.bf16.mxu0 %v800_v22 }
  0x19   :  { %493 = vmatpush1.bf16.msra.mxu1 %v807_v26 }
  0x1a   :  { %532 = vmatpush1.bf16.msra.mxu0 %v798_v25  ;;  %494 = vmatprep.subr.bf16.mxu1 %v808_v28 }
  0x1b   :  { %533 = vmatprep.subr.bf16.mxu0 %v806_v27 }
  0x1d   :  { %495 = vmatpush1.bf16.msra.mxu1 %v813_v30 }
  0x1e   :  { %534 = vmatpush1.bf16.msra.mxu0 %v804_v29 }
  0x1f   :  { %535 = vmatprep.subr.bf16.mxu0 %v812_v31 }
  0x20   :  { %10 = vsyncpa [#allocation3], 0  ;;  %v814_v33 = vld [vmem:[%s1124_s3 + $0x18c] ss:$28 sps:$4 sm:$0xff]   ;;  %v818_v34 = vld [vmem:[%s1124_s3 + $0x194] ss:$28 sps:$4 sm:$0xff]   ;;  %v159_v7 = vlaneseq }
  0x21   :  { %v816_v35 = vld [vmem:[%s1124_s3 + $0x190] ss:$28 sps:$4 sm:$0xff]   ;;  %v819_v36 = vld [vmem:[%s1124_s3 + $0x188] ss:$28 sps:$4 sm:$0xff]   ;;  %496 = vmatprep.subr.bf16.mxu1 %v814_v33  ;;  %v878_v38 = vmov 0  }
  0x22   :  { %536 = vmatpush1.bf16.msra.mxu0 %v810_v32  ;;  %497 = vmatpush1.bf16.msra.mxu1 %v819_v36  ;;  %v822_v37 = vld [vmem:[%s1124_s3 + $0x14] ss:$28 sps:$4 sm:$0xff]   ;;  %v666_v39 = vld [vmem:[%s1123_s2] ss:$0 sm:$0xff]  ;;  %v826_v49 = vld [vmem:[%s1124_s3 + $0x4c] ss:$28 sps:$4 sm:$0xff]  }
  0x23   :  { %537 = vmatprep.subr.bf16.mxu0 %v818_v34  ;;  %514 = vmatprep.mubr.bf16.mxu1 %v878_v38  ;;  %v820_v46 = vld [vmem:[%s1124_s3 + $0x10] ss:$28 sps:$4 sm:$0xff]   ;;  %v823_v47 = vld [vmem:[%s1124_s3 + $0x18] ss:$28 sps:$4 sm:$0xff]   ;;  %v824_v50 = vld [vmem:[%s1124_s3 + $0x48] ss:$28 sps:$4 sm:$0xff]  }
  0x24   :  { %555 = vmatprep.mubr.bf16.mxu0 %v878_v38  ;;  %564 = vmatprep.subr.bf16.mxu1 %v822_v37  ;;  %v827_v51 = vld [vmem:[%s1124_s3 + $0x50] ss:$28 sps:$4 sm:$0xff]   ;;  %v830_v52 = vld [vmem:[%s1124_s3 + $0x84] ss:$28 sps:$4 sm:$0xff]   ;;  %v834_v55 = vld [vmem:[%s1124_s3 + $0xbc] ss:$28 sps:$4 sm:$0xff]  }
  0x25   :  { %v828_v53 = vld [vmem:[%s1124_s3 + $0x80] ss:$28 sps:$4 sm:$0xff]   ;;  %v831_v54 = vld [vmem:[%s1124_s3 + $0x88] ss:$28 sps:$4 sm:$0xff]   ;;  %v832_v56 = vld [vmem:[%s1124_s3 + $0xb8] ss:$28 sps:$4 sm:$0xff]  }
  0x26   :  { %538 = vmatpush1.bf16.msra.mxu0 %v816_v35  ;;  %v835_v57 = vld [vmem:[%s1124_s3 + $0xc0] ss:$28 sps:$4 sm:$0xff]   ;;  %v838_v58 = vld [vmem:[%s1124_s3 + $0xf4] ss:$28 sps:$4 sm:$0xff]   ;;  %v842_v61 = vld [vmem:[%s1124_s3 + $0x12c] ss:$28 sps:$4 sm:$0xff]  }
  0x27   :  { %746 = vmatprep.subr.bf16.mxu0 %v876_v1  ;;  %v836_v59 = vld [vmem:[%s1124_s3 + $0xf0] ss:$28 sps:$4 sm:$0xff]   ;;  %v839_v60 = vld [vmem:[%s1124_s3 + $0xf8] ss:$28 sps:$4 sm:$0xff]   ;;  %v840_v62 = vld [vmem:[%s1124_s3 + $0x128] ss:$28 sps:$4 sm:$0xff]  }
  0x28   :  { %v843_v63 = vld [vmem:[%s1124_s3 + $0x130] ss:$28 sps:$4 sm:$0xff]   ;;  %v846_v0 = vld [vmem:[%s1124_s3 + $0x164] ss:$28 sps:$4 sm:$0xff]   ;;  %v850_v4 = vld [vmem:[%s1124_s3 + $0x19c] ss:$28 sps:$4 sm:$0xff]  }
  0x29   :  { %v844_v2 = vld [vmem:[%s1124_s3 + $0x160] ss:$28 sps:$4 sm:$0xff]   ;;  %v847_v3 = vld [vmem:[%s1124_s3 + $0x168] ss:$28 sps:$4 sm:$0xff]   ;;  %v848_v5 = vld [vmem:[%s1124_s3 + $0x198] ss:$28 sps:$4 sm:$0xff]  }
  0x2a   :  { %v851_v6 = vld [vmem:[%s1124_s3 + $0x1a0] ss:$28 sps:$4 sm:$0xff]   ;;  %v160_v8 = vshrl.u32 %v159_v7, 7  ;;  %s879_s3 = smov [#allocation2]  }
  0x2b   :  { %v157_v11 = vld [vmem:[%s1125_s4] sm:$0x7f]  ;;  %s658_s4 = sshll.u32 %s879_s3, 4  ;;  %s659_s4 = int_to_ptr.vmem [resolvable:$true] %s658_s4 }
  0x2c   :  { %v161_v9 = vsub.s32 0, %v160_v8  ;;  %v169_v10 = vsub.s32 2, %v160_v8  ;;  %v165_v12 = vsub.s32 1, %v160_v8  ;;  %v173_v13 = vsub.s32 3, %v160_v8  ;;  %s852_s29 = scalar_lea.vmem %s659_s4, 896  ;;  %p857_p1 = scmp.lt.s32.totalorder %s659_s4, %s659_s4 }
  0x2d   :  { %v177_v29 = vsub.s32 4, %v160_v8  ;;  %v185_v30 = vsub.s32 6, %v160_v8  ;;  %v181_v31 = vsub.s32 5, %v160_v8  ;;  %p853_p0 = scmp.ne.s32.totalorder %s659_s4, %s852_s29  ;;  %p858_p2 = scmp.lt.s32.totalorder %s852_s29, %s852_s29 }
  0x2e   :  { %v162_v14 = vrot.slane %v157_v11, %v161_v9  ;;  %v170_v15 = vrot.slane %v157_v11, %v169_v10  ;;  %v166_v16 = vrot.slane %v157_v11, %v165_v12  ;;  %v174_v17 = vrot.slane %v157_v11, %v173_v13 }
  0x2f   :  { %v178_v32 = vrot.slane %v157_v11, %v177_v29  ;;  %v186_v33 = vrot.slane %v157_v11, %v185_v30  ;;  %v182_v34 = vrot.slane %v157_v11, %v181_v31  ;;  %p859_p3 = por %p858_p2, %p857_p1 }
  0x31   :  { %p860_p4 = pnand %p859_p3, %p853_p0 }
  0xdc   :  { %v85_v40 = vpop.f32.mrb[0].mxu0 }
  0xdd   :  { %v86_v41 = vadd.f32 %v666_v39, %v85_v40  ;;  %v744_v42 = vpop.f32.mrb[1].mxu0 }
  0xde   :  { %v88_v43 = vpop.f32.mrb[2].mxu0 }
  0xdf   :  { %v91_v44 = vmax.f32 %v86_v41, 0.0  ;;  %v745_v45 = vpop.f32.mrb[3].mxu0 }
  0xe1   :  { %v92_v48 = vpack.c.bf16 %v91_v44, %v91_v44 }
  0xe3   :  { %515 = vmatmul.mubr.bf16.vlgmr.msra.gmra.mrb[0].mxu1 %v92_v48  ;;  %556 = vmatmul.mubr.bf16.vlgmr.msra.gmra.mrb[4].mxu0 %v92_v48 }
  0xe4   :  { %565 = vmatpush1.bf16.msra.mxu1 %v820_v46  ;;  %747 = vmatpush3.bf16.msra.mxu0 %v823_v47 }
  0xe5   :  { %566 = vmatprep.subr.bf16.mxu1 %v826_v49  ;;  %748 = vmatprep.subr.bf16.mxu0 %v876_v1 }
  0xe6   :  { %596 = vmatprep.mubr.bf16.mxu1 %v878_v38  ;;  %762 = vmatprep.mubr.msk.bf16.mxu0 %vm877_vm0, %v876_v1 }
  0xe8   :  { %567 = vmatpush1.bf16.msra.mxu1 %v824_v50  ;;  %749 = vmatpush3.bf16.msra.mxu0 %v827_v51 }
  0xe9   :  { %568 = vmatprep.subr.bf16.mxu1 %v830_v52  ;;  %750 = vmatprep.subr.bf16.mxu0 %v876_v1 }
  0xec   :  { %569 = vmatpush1.bf16.msra.mxu1 %v828_v53  ;;  %751 = vmatpush3.bf16.msra.mxu0 %v831_v54 }
  0xed   :  { %570 = vmatprep.subr.bf16.mxu1 %v834_v55  ;;  %752 = vmatprep.subr.bf16.mxu0 %v876_v1 }
  0xf0   :  { %571 = vmatpush1.bf16.msra.mxu1 %v832_v56  ;;  %753 = vmatpush3.bf16.msra.mxu0 %v835_v57 }
  0xf1   :  { %572 = vmatprep.subr.bf16.mxu1 %v838_v58  ;;  %754 = vmatprep.subr.bf16.mxu0 %v876_v1 }
  0xf4   :  { %573 = vmatpush1.bf16.msra.mxu1 %v836_v59  ;;  %755 = vmatpush3.bf16.msra.mxu0 %v839_v60 }
  0xf5   :  { %574 = vmatprep.subr.bf16.mxu1 %v842_v61  ;;  %756 = vmatprep.subr.bf16.mxu0 %v876_v1 }
  0xf8   :  { %575 = vmatpush1.bf16.msra.mxu1 %v840_v62  ;;  %757 = vmatpush3.bf16.msra.mxu0 %v843_v63 }
  0xf9   :  { %576 = vmatprep.subr.bf16.mxu1 %v846_v0  ;;  %758 = vmatprep.subr.bf16.mxu0 %v876_v1 }
  0xfc   :  { %577 = vmatpush1.bf16.msra.mxu1 %v844_v2  ;;  %759 = vmatpush3.bf16.msra.mxu0 %v847_v3 }
  0xfd   :  { %578 = vmatprep.subr.bf16.mxu1 %v850_v4  ;;  %760 = vmatprep.subr.bf16.mxu0 %v876_v1 }
 0x100   :  { %579 = vmatpush1.bf16.msra.mxu1 %v848_v5  ;;  %761 = vmatpush3.bf16.msra.mxu0 %v851_v6 }
 0x103   :  { %597 = vmatmul.mubr.bf16.vlgmr.msra.gmra.mrb[4].mxu1 %v92_v48  ;;  %763 = vmatmul.mubr.bf16.vlgmr.msra.gmra.mrb[8].mxu0 %v92_v48 }
 0x1b6   :  { %v516_v18 = vpop.f32.mrb[0].mxu1  ;;  %v557_v1 = vpop.f32.mrb[4].mxu0 }
 0x1b7   :  { %v517_v19 = vadd.f32 %v516_v18, %v162_v14  ;;  %v558_v20 = vadd.f32 %v557_v1, %v170_v15  ;;  %v518_v21 = vpop.f32.mrb[1].mxu1  ;;  %v559_v22 = vpop.f32.mrb[5].mxu0 }
 0x1b8   :  { %v519_v23 = vadd.f32 %v518_v21, %v166_v16  ;;  %v560_v24 = vadd.f32 %v559_v22, %v174_v17  ;;  %v520_v25 = vpop.f32.mrb[2].mxu1  ;;  %v561_v26 = vpop.f32.mrb[6].mxu0 }
 0x1b9   :  { %645 = vst [vmem:[#allocation2] sm:$0xff] %v517_v19  ;;  %647 = vst [vmem:[#allocation2 + $0x10] sm:$0xff] %v558_v20  ;;  %v521_v27 = vpop.f32.mrb[3].mxu1  ;;  %v562_v28 = vpop.f32.mrb[7].mxu0 }
 0x1ba   :  { %646 = vst [vmem:[#allocation2 + $0x8] sm:$0xff] %v519_v23  ;;  %648 = vst [vmem:[#allocation2 + $0x18] sm:$0xff] %v560_v24 }
 0x1d6   :  { %v598_v35 = vpop.f32.mrb[4].mxu1  ;;  %v639_v36 = vpop.f32.mrb[8].mxu0 }
 0x1d7   :  { %v599_v37 = vadd.f32 %v598_v35, %v178_v32  ;;  %v640_v38 = vadd.f32 %v639_v36, %v186_v33  ;;  %v600_v39 = vpop.f32.mrb[5].mxu1  ;;  %v764_v40 = vpop.f32.mrb[9].mxu0 }
 0x1d8   :  { %v601_v41 = vadd.f32 %v600_v39, %v182_v34  ;;  %v602_v42 = vpop.f32.mrb[6].mxu1  ;;  %v642_v43 = vpop.f32.mrb[10].mxu0 }
 0x1d9   :  { %649 = vst [vmem:[#allocation2 + $0x20] sm:$0xff] %v599_v37  ;;  %651 = vst.msk [vmem:[#allocation2 + $0x30] sm:$0xff] %vm47_vm1, %v640_v38  ;;  %v603_v44 = vpop.f32.mrb[7].mxu1  ;;  %v765_v45 = vpop.f32.mrb[11].mxu0 }
 0x1da   :  { %650 = vst [vmem:[#allocation2 + $0x28] sm:$0xff] %v601_v41 }
 0x1db   :  { %863 = shalt.err (!%p860_p4)
}
 0x1dc   :  { %s864_s6 = scalar_lea.hbm %s1126_s5, 896 }
 0x1dd   :  { %p865_p5 = scmp.ne.s32.totalorder %s1126_s5, %s864_s6  ;;  %p868_p6 = scmp.lt.u32.totalorder %s864_s6, %s1126_s5 }
 0x1df   :  { %p870_p7 = pnand %p868_p6, %p865_p5 }
 0x1e1   :  { %873 = shalt.err (!%p870_p7)
}
 0x1e2   :  { %661 = dma.vmem_to_hbm [thread:$0]  %s659_s4, 896, %s1126_s5, [#allocation3]  }
 0x1e3   :  { %874 = dma.done.wait [#allocation3], 896  }
 0x1e4   :  { %875 = vsyncadd [#allocation3], 4294966400 }
 0x1e5   :  { %665 = vsyncpa [#allocation3], 1 }

</bundles_post_ra>
